<compile_context>
chip_gen: v6e
topology: v6e:2x2x1
jax: 0.10.0
libtpu: 0.0.40
codegen_flags: <defaults>
</compile_context>

<pallas_src>
import jax
import jax.numpy as jnp
from jax.experimental import pallas as pl
from jax.experimental.pallas import tpu as pltpu

_LANE = 128
_MIN_TILE_M = 128  # MXU M-granularity floor (v5e 4x128, v6e/v7x 2x256)


def _round_up(v, m):
    return ((v + m - 1) // m) * m


def _pad2d(a, rows, cols):
    r, c = a.shape
    if r == rows and c == cols:
        return a
    return jnp.pad(a, ((0, rows - r), (0, cols - c)))


def _vmem_capacity_bytes():
    # Generation-aware physical VMEM: 128 MiB on v5e/v6e, 64 MiB per TensorCore on v7x.
    try:
        cap = int(pltpu.get_tpu_info().vmem_capacity_bytes)
        if cap > 0:
            return cap
    except Exception:
        pass
    return 128 * 1024 * 1024


# --------------------------------------------------------------------------------------
# Kernels
# --------------------------------------------------------------------------------------
def _mlp_kernel_resident(x_ref, w1_ref, b1_ref, w2_ref, b2_ref, w3_ref, b3_ref, o_ref):
    # x_ref: (tile_m, C_in) row tile; weights/biases are whole (hidden-padded) VMEM residents.
    x = x_ref[...]
    if x.dtype != w1_ref.dtype:
        x = x.astype(w1_ref.dtype)

    h1 = jnp.dot(x, w1_ref[...], preferred_element_type=jnp.float32)
    h1 = jnp.maximum(h1 + b1_ref[...].astype(jnp.float32), 0.0)

    h2 = jnp.dot(h1.astype(w2_ref.dtype), w2_ref[...], preferred_element_type=jnp.float32)
    h2 = jnp.maximum(h2 + b2_ref[...].astype(jnp.float32), 0.0)

    out = jnp.dot(h2.astype(w3_ref.dtype), w3_ref[...], preferred_element_type=jnp.float32)
    o_ref[...] = (out + b3_ref[...].astype(jnp.float32)).astype(o_ref.dtype)


def _mlp_kernel_hsplit(x_ref, w1_ref, b1_ref, w2_ref, b2_ref, w3_ref, b3_ref, o_ref,
                       acc_ref):
    # Hidden-dim K-split: grid = (row_tiles, k_tiles), k last / "arbitrary".
    #   h2_pre = sum_k relu(x @ W1[:, k] + b1[k]) @ W2[k, :]
    k = pl.program_id(1)

    @pl.when(k == 0)
    def _():
        acc_ref[...] = jnp.zeros_like(acc_ref)

    x = x_ref[...]
    if x.dtype != w1_ref.dtype:
        x = x.astype(w1_ref.dtype)

    h1 = jnp.dot(x, w1_ref[...], preferred_element_type=jnp.float32)
    h1 = jnp.maximum(h1 + b1_ref[...].astype(jnp.float32), 0.0)
    acc_ref[...] += jnp.dot(h1.astype(w2_ref.dtype), w2_ref[...],
                            preferred_element_type=jnp.float32)

    @pl.when(k == pl.num_programs(1) - 1)
    def _():
        h2 = jnp.maximum(acc_ref[...] + b2_ref[...].astype(jnp.float32), 0.0)
        out = jnp.dot(h2.astype(w3_ref.dtype), w3_ref[...],
                      preferred_element_type=jnp.float32)
        o_ref[...] = (out + b3_ref[...].astype(jnp.float32)).astype(o_ref.dtype)


# --------------------------------------------------------------------------------------
# Wrapper
# --------------------------------------------------------------------------------------
def mlp_forward(x, params, *, compute_dtype=None, max_tile_m=512, x_buffer_count=2,
                force_hidden_split=False, max_hidden_tile=None, vmem_budget_bytes=None):
    """x: [..., C_in] -> [..., C_out], matching MLP.forward (dropout=0, n_midlayers=1).

    compute_dtype: optionally cast weights (e.g. jnp.bfloat16) for the bf16-native MXU on
    v6e/v7x; accumulation stays f32 in-kernel (bf16 configs need looser test tolerances).
    """
    w1, b1, w2, b2, w3, b3 = params
    c_in, hid = w1.shape
    c_out = w3.shape[1]

    lead = x.shape[:-1]
    n = 1
    for d in lead:
        n *= d
    x2d = x.reshape(n, c_in)

    if compute_dtype is not None:
        w1, w2, w3 = (w.astype(compute_dtype) for w in (w1, w2, w3))

    w_dtype = w1.dtype
    wb = jnp.dtype(w_dtype).itemsize
    xb = jnp.dtype(x.dtype).itemsize
    cast_b = wb if jnp.dtype(w_dtype) != jnp.dtype(jnp.float32) else 0

    # Only the hidden dim is lane-padded; zero padding is inert through Linear+ReLU.
    hid_p = _round_up(hid, _LANE)
    b2p = _pad2d(b2.reshape(1, -1), 1, hid_p)
    w3p = _pad2d(w3, hid_p, c_out)
    b3p = b3.reshape(1, -1)

    # Generation-aware budget: ~3/4 of physical VMEM (per-TC on v7x since "parallel" row
    # tiles replicate the resident weights into each core's VMEM).
    vmem_cap = _vmem_capacity_bytes()
    if vmem_budget_bytes is None:
        vmem_budget_bytes = (vmem_cap * 3) // 4
    vmem_ceiling = vmem_cap - 8 * 1024 * 1024  # leave headroom below physical

    tile_m = min(_round_up(max_tile_m, _MIN_TILE_M), _round_up(max(n, 1), _MIN_TILE_M))
    tile_m = max(tile_m, _MIN_TILE_M)

    resident_w_bytes = (c_in * hid_p + hid_p * hid_p + hid_p * c_out
                        + 2 * hid_p + c_out) * wb

    def est_resident(tm):
        xio = x_buffer_count * tm * c_in * xb + 2 * tm * c_out * xb   # pipelined x / out tiles
        inter = 2 * tm * hid_p * 4 + tm * c_out * 4                   # f32 h1/h2 + pre-cast out
        casts = 2 * tm * hid_p * cast_b                               # bf16 copies of h1/h2
        return resident_w_bytes + xio + inter + casts

    use_split = force_hidden_split or est_resident(_MIN_TILE_M) > vmem_budget_bytes

    if not use_split:
        # ---------------- Resident-weights fast path ----------------
        while tile_m > _MIN_TILE_M and est_resident(tile_m) > vmem_budget_bytes:
            tile_m = max(_MIN_TILE_M, _round_up(tile_m // 2, _MIN_TILE_M))

        n_pad = _round_up(n, tile_m)
        if n_pad != n:
            x2d = _pad2d(x2d, n_pad, c_in)

        w1p = _pad2d(w1, c_in, hid_p)
        b1p = _pad2d(b1.reshape(1, -1), 1, hid_p)
        w2p = _pad2d(w2, hid_p, hid_p)

        vmem_limit = int(min(vmem_ceiling,
                             max(32 * 1024 * 1024,
                                 int(est_resident(tile_m) * 1.25) + (1 << 20))))

        resident = pl.BlockSpec(memory_space=pltpu.MemorySpace.VMEM)
        x_kwargs = {}
        if x_buffer_count != 2 and hasattr(pl, "Buffered"):
            # Deeper x pipeline for DMA-exposed small-hidden configs (opt-in).
            x_kwargs = dict(pipeline_mode=pl.Buffered(x_buffer_count))
        x_spec = pl.BlockSpec((tile_m, c_in), lambda i: (i, 0), **x_kwargs)

        out2d = pl.pallas_call(
            _mlp_kernel_resident,
            out_shape=jax.ShapeDtypeStruct((n_pad, c_out), x.dtype),
            grid_spec=pltpu.PrefetchScalarGridSpec(
                num_scalar_prefetch=0,
                grid=(n_pad // tile_m,),
                in_specs=[
                    x_spec,                                   # x row tile (pipelined)
                    resident, resident,                       # W1, b1
                    resident, resident,                       # W2, b2
                    resident, resident,                       # W3, b3
                ],
                out_specs=pl.BlockSpec((tile_m, c_out), lambda i: (i, 0)),
            ),
            compiler_params=pltpu.CompilerParams(
                dimension_semantics=("parallel",),            # v7x: shard rows across 2 TCs
                vmem_limit_bytes=vmem_limit,
            ),
        )(x2d, w1p, b1p, w2p, b2p, w3p, b3p)
    else:
        # ---------------- Hidden-dim K-split path (weights don't fit resident) ----------------
        tk = hid_p if max_hidden_tile is None else min(hid_p, _round_up(max_hidden_tile, _LANE))

        def est_split(tm, tk_):
            res = (hid_p * c_out + hid_p + c_out) * wb                 # resident W3, b2, b3
            per_k = 2 * (c_in * tk_ + tk_ + tk_ * hid_p) * wb          # double-buffered W1/b1/W2
            xio = 2 * tm * c_in * xb + 2 * tm * c_out * xb
            acc = tm * hid_p * 4
            inter = tm * tk_ * 4 + tm * c_out * 4 + tm * tk_ * cast_b + tm * hid_p * cast_b
            return res + per_k + xio + acc + inter

        while tk > _LANE and est_split(tile_m, tk) > vmem_budget_bytes:
            tk = max(_LANE, _round_up(tk // 2, _LANE))
        while tile_m > _MIN_TILE_M and est_split(tile_m, tk) > vmem_budget_bytes:
            tile_m = max(_MIN_TILE_M, _round_up(tile_m // 2, _MIN_TILE_M))
        # TODO(synk): also K-split the third matmul (W3) when hid_p*c_out alone exceeds the budget.

        n_pad = _round_up(n, tile_m)
        if n_pad != n:
            x2d = _pad2d(x2d, n_pad, c_in)

        hid1_p = _round_up(hid_p, tk)               # first-layer hidden padded to a tk multiple
        k_tiles = hid1_p // tk
        w1p = _pad2d(w1, c_in, hid1_p)
        b1p = _pad2d(b1.reshape(1, -1), 1, hid1_p)
        w2p = _pad2d(w2, hid1_p, hid_p)

        vmem_limit = int(min(vmem_ceiling,
                             max(32 * 1024 * 1024,
                                 int(est_split(tile_m, tk) * 1.25) + (1 << 20))))

        resident = pl.BlockSpec(memory_space=pltpu.MemorySpace.VMEM)

        out2d = pl.pallas_call(
            _mlp_kernel_hsplit,
            out_shape=jax.ShapeDtypeStruct((n_pad, c_out), x.dtype),
            grid_spec=pltpu.PrefetchScalarGridSpec(
                num_scalar_prefetch=0,
                grid=(n_pad // tile_m, k_tiles),
                in_specs=[
                    pl.BlockSpec((tile_m, c_in), lambda i, k: (i, 0)),   # x row tile
                    pl.BlockSpec((c_in, tk), lambda i, k: (0, k)),       # W1 column tile
                    pl.BlockSpec((1, tk), lambda i, k: (0, k)),          # b1 tile
                    pl.BlockSpec((tk, hid_p), lambda i, k: (k, 0)),      # W2 row tile
                    resident, resident, resident,                        # b2, W3, b3
                ],
                out_specs=pl.BlockSpec((tile_m, c_out), lambda i, k: (i, 0)),
                scratch_shapes=[pltpu.VMEM((tile_m, hid_p), jnp.float32)],
            ),
            compiler_params=pltpu.CompilerParams(
                dimension_semantics=("parallel", "arbitrary"),
                vmem_limit_bytes=vmem_limit,
            ),
        )(x2d, w1p, b1p, w2p, b2p, w3p, b3p)

    return out2d[:n].reshape(*lead, c_out)


# --------------------------------------------------------------------------------------
# Init / reference
# --------------------------------------------------------------------------------------
def init_mlp_params(key, input_channel, hidden_dim, output_channel,
                    forward_expansion=1, n_midlayers=1, dtype=jnp.float32):
    """Init mimicking nn.Linear default (uniform +/- 1/sqrt(fan_in)).

    Weights stored as [fan_in, fan_out] (transpose of PyTorch layout).
    """
    assert n_midlayers == 1  # TODO(synk): generalize kernel/init to arbitrary n_midlayers
    h = hidden_dim * forward_expansion
    ks = jax.random.split(key, 6)

    def lin(kw, kb, fan_in, fan_out):
        bound = 1.0 / jnp.sqrt(fan_in)
        w = jax.random.uniform(kw, (fan_in, fan_out), dtype, -bound, bound)
        b = jax.random.uniform(kb, (1, fan_out), dtype, -bound, bound)
        return w, b

    w1, b1 = lin(ks[0], ks[1], input_channel, h)
    w2, b2 = lin(ks[2], ks[3], h, h)
    w3, b3 = lin(ks[4], ks[5], h, output_channel)
    return (w1, b1, w2, b2, w3, b3)


def mlp_reference(x, params):
    w1, b1, w2, b2, w3, b3 = params
    h1 = jnp.maximum(x @ w1 + b1[0], 0.0)
    h2 = jnp.maximum(h1 @ w2 + b2[0], 0.0)
    return h2 @ w3 + b3[0]


if __name__ == "__main__":
    key = jax.random.PRNGKey(0)
    k_x, k_p, k_x2, k_p2 = jax.random.split(key, 4)

    # --- Test 1: shipped config (forward_expansion=1, n_midlayers=1, dropout=0), resident path
    input_channel, hidden_dim, output_channel = 4, 32, 4
    x = jax.random.normal(k_x, (2, 8, input_channel), dtype=jnp.float32)
    params = init_mlp_params(k_p, input_channel, hidden_dim, output_channel)

    out = jax.block_until_ready(mlp_forward(x, params))
    ref = mlp_reference(x.reshape(-1, input_channel), params).reshape(
        *x.shape[:-1], output_channel)
    assert out.shape == (2, 8, output_channel), out.shape
    assert jnp.allclose(out, ref, atol=1e-5, rtol=1e-5), "resident-weight path mismatch"

    # --- Test 2: hidden-dim K-split fallback (v7x large-weights path), with ragged rows,
    #     multiple row tiles and multiple K tiles (grid (2, 2)).
    in2, hid2, out2c = 4, 256, 8
    x2 = jax.random.normal(k_x2, (2, 72, in2), dtype=jnp.float32)   # n=144 -> padded to 256 rows
    params2 = init_mlp_params(k_p2, in2, hid2, out2c)
    out2 = jax.block_until_ready(
        mlp_forward(x2, params2, force_hidden_split=True, max_hidden_tile=128, max_tile_m=128))
    ref2 = mlp_reference(x2.reshape(-1, in2), params2).reshape(*x2.shape[:-1], out2c)
    assert out2.shape == (2, 72, out2c), out2.shape
    assert jnp.allclose(out2, ref2, atol=1e-4, rtol=1e-4), "hidden-split path mismatch"

    print("KERNEL_OK")
</pallas_src>

<mosaic_0001>
module attributes {stable_mosaic.version = 11 : i64} {
  func.func @_mlp_kernel_resident(%arg0: i32, %arg1: memref<128x4xf32, #tpu.memory_space<vmem>>, %arg2: memref<4x128xf32, #tpu.memory_space<vmem>>, %arg3: memref<1x128xf32, #tpu.memory_space<vmem>>, %arg4: memref<128x128xf32, #tpu.memory_space<vmem>>, %arg5: memref<1x128xf32, #tpu.memory_space<vmem>>, %arg6: memref<128x4xf32, #tpu.memory_space<vmem>>, %arg7: memref<1x4xf32, #tpu.memory_space<vmem>>, %arg8: memref<128x4xf32, #tpu.memory_space<vmem>>) attributes {dimension_semantics = [#tpu.dimension_semantics<parallel>], iteration_bounds = array<i64: 1>, scalar_prefetch = 0 : i64, scratch_operands = 0 : i64, tpu.core_type = #tpu.core_type<tc>, window_params = [{transform_indices = @transform_0, window_bounds = array<i64: 128, 4>}, {pipeline_mode = #tpu.pipeline_mode<synchronous>, transform_indices = @transform_1, window_bounds = array<i64: 4, 128>}, {pipeline_mode = #tpu.pipeline_mode<synchronous>, transform_indices = @transform_2, window_bounds = array<i64: 1, 128>}, {pipeline_mode = #tpu.pipeline_mode<synchronous>, transform_indices = @transform_3, window_bounds = array<i64: 128, 128>}, {pipeline_mode = #tpu.pipeline_mode<synchronous>, transform_indices = @transform_4, window_bounds = array<i64: 1, 128>}, {pipeline_mode = #tpu.pipeline_mode<synchronous>, transform_indices = @transform_5, window_bounds = array<i64: 128, 4>}, {pipeline_mode = #tpu.pipeline_mode<synchronous>, transform_indices = @transform_6, window_bounds = array<i64: 1, 4>}, {transform_indices = @transform_7, window_bounds = array<i64: 128, 4>}]} {
    %c0 = arith.constant 0 : index
    %c0_0 = arith.constant 0 : index
    %0 = vector.load %arg1[%c0, %c0_0] : memref<128x4xf32, #tpu.memory_space<vmem>>, vector<128x4xf32>
    %c0_1 = arith.constant 0 : index
    %c0_2 = arith.constant 0 : index
    %1 = vector.load %arg2[%c0_1, %c0_2] : memref<4x128xf32, #tpu.memory_space<vmem>>, vector<4x128xf32>
    %cst = arith.constant dense<0.000000e+00> : vector<128x128xf32>
    %2 = tpu.matmul %0, %1, %cst {dimension_numbers = #tpu.dot_dimension_numbers<[1], [0], [0], [1], [0, 0, 1, 1], [], []>} : vector<128x4xf32>, vector<4x128xf32>, vector<128x128xf32> -> vector<128x128xf32>
    %c0_3 = arith.constant 0 : index
    %c0_4 = arith.constant 0 : index
    %3 = vector.load %arg3[%c0_3, %c0_4] : memref<1x128xf32, #tpu.memory_space<vmem>>, vector<1x128xf32>
    %4 = vector.broadcast %3 : vector<1x128xf32> to vector<128x128xf32>
    %5 = arith.addf %2, %4 : vector<128x128xf32>
    %cst_5 = arith.constant 0.000000e+00 : f32
    %6 = vector.broadcast %cst_5 : f32 to vector<128x128xf32>
    %7 = arith.maximumf %5, %6 : vector<128x128xf32>
    %c0_6 = arith.constant 0 : index
    %c0_7 = arith.constant 0 : index
    %8 = vector.load %arg4[%c0_6, %c0_7] : memref<128x128xf32, #tpu.memory_space<vmem>>, vector<128x128xf32>
    %cst_8 = arith.constant dense<0.000000e+00> : vector<128x128xf32>
    %9 = tpu.matmul %7, %8, %cst_8 {dimension_numbers = #tpu.dot_dimension_numbers<[1], [0], [0], [1], [0, 0, 1, 1], [], []>} : vector<128x128xf32>, vector<128x128xf32>, vector<128x128xf32> -> vector<128x128xf32>
    %c0_9 = arith.constant 0 : index
    %c0_10 = arith.constant 0 : index
    %10 = vector.load %arg5[%c0_9, %c0_10] : memref<1x128xf32, #tpu.memory_space<vmem>>, vector<1x128xf32>
    %11 = vector.broadcast %10 : vector<1x128xf32> to vector<128x128xf32>
    %12 = arith.addf %9, %11 : vector<128x128xf32>
    %cst_11 = arith.constant 0.000000e+00 : f32
    %13 = vector.broadcast %cst_11 : f32 to vector<128x128xf32>
    %14 = arith.maximumf %12, %13 : vector<128x128xf32>
    %c0_12 = arith.constant 0 : index
    %c0_13 = arith.constant 0 : index
    %15 = vector.load %arg6[%c0_12, %c0_13] : memref<128x4xf32, #tpu.memory_space<vmem>>, vector<128x4xf32>
    %cst_14 = arith.constant dense<0.000000e+00> : vector<128x4xf32>
    %16 = tpu.matmul %14, %15, %cst_14 {dimension_numbers = #tpu.dot_dimension_numbers<[1], [0], [0], [1], [0, 0, 1, 1], [], []>} : vector<128x128xf32>, vector<128x4xf32>, vector<128x4xf32> -> vector<128x4xf32>
    %c0_15 = arith.constant 0 : index
    %c0_16 = arith.constant 0 : index
    %17 = vector.load %arg7[%c0_15, %c0_16] : memref<1x4xf32, #tpu.memory_space<vmem>>, vector<1x4xf32>
    %18 = vector.broadcast %17 : vector<1x4xf32> to vector<128x4xf32>
    %19 = arith.addf %16, %18 : vector<128x4xf32>
    %c0_17 = arith.constant 0 : index
    %c0_18 = arith.constant 0 : index
    %20 = vector.load %arg8[%c0_17, %c0_18] : memref<128x4xf32, #tpu.memory_space<vmem>>, vector<128x4xf32>
    tpu.vector_store %arg8[%c0_17, %c0_18], %19 {strides = array<i32>} : memref<128x4xf32, #tpu.memory_space<vmem>>, vector<128x4xf32>,
    return
  }
  func.func @transform_0(%arg0: i32) -> (i32, i32) {
    %c0_i32 = arith.constant 0 : i32
    %c0_i32_0 = arith.constant 0 : i32
    return %arg0, %c0_i32 : i32, i32
  }
  func.func @transform_1(%arg0: i32) -> (i32, i32) {
    %c0_i32 = arith.constant 0 : i32
    %c0_i32_0 = arith.constant 0 : i32
    %c0_i32_1 = arith.constant 0 : i32
    return %c0_i32, %c0_i32_0 : i32, i32
  }
  func.func @transform_2(%arg0: i32) -> (i32, i32) {
    %c0_i32 = arith.constant 0 : i32
    %c0_i32_0 = arith.constant 0 : i32
    %c0_i32_1 = arith.constant 0 : i32
    return %c0_i32, %c0_i32_0 : i32, i32
  }
  func.func @transform_3(%arg0: i32) -> (i32, i32) {
    %c0_i32 = arith.constant 0 : i32
    %c0_i32_0 = arith.constant 0 : i32
    %c0_i32_1 = arith.constant 0 : i32
    return %c0_i32, %c0_i32_0 : i32, i32
  }
  func.func @transform_4(%arg0: i32) -> (i32, i32) {
    %c0_i32 = arith.constant 0 : i32
    %c0_i32_0 = arith.constant 0 : i32
    %c0_i32_1 = arith.constant 0 : i32
    return %c0_i32, %c0_i32_0 : i32, i32
  }
  func.func @transform_5(%arg0: i32) -> (i32, i32) {
    %c0_i32 = arith.constant 0 : i32
    %c0_i32_0 = arith.constant 0 : i32
    %c0_i32_1 = arith.constant 0 : i32
    return %c0_i32, %c0_i32_0 : i32, i32
  }
  func.func @transform_6(%arg0: i32) -> (i32, i32) {
    %c0_i32 = arith.constant 0 : i32
    %c0_i32_0 = arith.constant 0 : i32
    %c0_i32_1 = arith.constant 0 : i32
    return %c0_i32, %c0_i32_0 : i32, i32
  }
  func.func @transform_7(%arg0: i32) -> (i32, i32) {
    %c0_i32 = arith.constant 0 : i32
    %c0_i32_0 = arith.constant 0 : i32
    return %arg0, %c0_i32 : i32, i32
  }
}

</mosaic_0001>

<bundles_post_ra>
// kernel: tpu_custom_call.1
= control target key start
LH: loop header
LB: loop body
LE: loop exit
PB: predicated region body
PF: predicated region fallthrough
CT: control target
= control target key end

     0   :  { %vm99_vm0 = vcmask 1043456   ;;  %vm50_vm1 = vcmask 31744   ;;  %s1151_s1 = inlined_call_operand.vmem [shape: f32[4,128], index: 1, kind: input, shape index: {}]   ;;  %s1152_s0 = inlined_call_operand.vmem [shape: f32[128,4], index: 0, kind: input, shape index: {}]   ;;  %s1153_s3 = inlined_call_operand.vmem [shape: f32[128,128], index: 3, kind: input, shape index: {}]   ;;  %s1154_s5 = inlined_call_operand.vmem [shape: f32[128,4], index: 5, kind: input, shape index: {}]   ;;  %s1155_s2 = inlined_call_operand.vmem [shape: f32[1,128], index: 2, kind: input, shape index: {}]   ;;  %s1156_s4 = inlined_call_operand.vmem [shape: f32[1,128], index: 4, kind: input, shape index: {}]   ;;  %s1157_s6 = inlined_call_operand.vmem [shape: f32[1,4], index: 6, kind: input, shape index: {}]   ;;  %s1158_s7 = inlined_call_operand.vmem [shape: f32[128,4], index: 7, kind: output, shape index: {}]  }
   0x1   :  { %v42_v0 = vld [vmem:[%s1151_s1] sm:$0xf]  ;;  %v27_v2 = vld [vmem:[%s1152_s0 + $0x8] sm:$0xff]  ;;  %v28_v3 = vld [vmem:[%s1152_s0 + $0x10] sm:$0xff] }
   0x2   :  { %v26_v1 = vld [vmem:[%s1152_s0] sm:$0xff]  ;;  %737 = vmatprep.subr.msk.mxu0 %vm99_vm0, %v42_v0  ;;  %v29_v4 = vld [vmem:[%s1152_s0 + $0x18] sm:$0xff]  ;;  %v278_v7 = vld [vmem:[%s1153_s3 + $0x70] sm:$0xff] }
   0x3   :  { %739 = vmatprep.mubr.msk.f32.mxu0 %vm50_vm1, %v26_v1  ;;  %738 = vmatpush3.msk.msra.mxu0 %vm99_vm0, %v42_v0  ;;  %v30_v5 = vld [vmem:[%s1152_s0 + $0x20] sm:$0xff]  ;;  %v279_v6 = vld [vmem:[%s1153_s3 + $0x78] sm:$0xff]  ;;  %v277_v8 = vld [vmem:[%s1153_s3 + $0x68] sm:$0xff] }
   0x4   :  { %740 = vmatmul.mubr.msk.f32.vlgmr.msra.gmra.mxu0 %vm50_vm1, %v27_v2  ;;  %763 = vmatprep.subr.mxu1 %v279_v6  ;;  %v31_v9 = vld [vmem:[%s1152_s0 + $0x28] sm:$0xff]  ;;  %v32_v10 = vld [vmem:[%s1152_s0 + $0x30] sm:$0xff]  ;;  %v276_v11 = vld [vmem:[%s1153_s3 + $0x60] sm:$0xff] }
   0x5   :  { %742 = vmatprep.mubr.msk.f32.mxu0 %vm50_vm1, %v28_v3  ;;  %764 = vmatpush3.msra.mxu1 %v279_v6  ;;  %v275_v12 = vld [vmem:[%s1153_s3 + $0x58] sm:$0xff]  ;;  %v34_v14 = vld [vmem:[%s1152_s0 + $0x40] sm:$0xff]  ;;  %v274_v15 = vld [vmem:[%s1153_s3 + $0x50] sm:$0xff] }
   0x6   :  { %765 = vmatprep.subr.mxu1 %v278_v7  ;;  %v33_v13 = vld [vmem:[%s1152_s0 + $0x38] sm:$0xff]  ;;  %v273_v16 = vld [vmem:[%s1153_s3 + $0x48] sm:$0xff]  ;;  %v36_v18 = vld [vmem:[%s1152_s0 + $0x50] sm:$0xff] }
   0x7   :  { %766 = vmatpush3.msra.mxu1 %v278_v7  ;;  %v35_v17 = vld [vmem:[%s1152_s0 + $0x48] sm:$0xff]  ;;  %v272_v19 = vld [vmem:[%s1153_s3 + $0x40] sm:$0xff]  ;;  %v271_v20 = vld [vmem:[%s1153_s3 + $0x38] sm:$0xff] }
   0x8   :  { %743 = vmatmul.mubr.msk.f32.gmra.mxu0 %vm50_vm1, %v29_v4  ;;  %767 = vmatprep.subr.mxu1 %v277_v8  ;;  %v37_v21 = vld [vmem:[%s1152_s0 + $0x58] sm:$0xff]  ;;  %v38_v22 = vld [vmem:[%s1152_s0 + $0x60] sm:$0xff]  ;;  %v270_v23 = vld [vmem:[%s1153_s3 + $0x30] sm:$0xff] }
   0x9   :  { %745 = vmatprep.mubr.msk.f32.mxu0 %vm50_vm1, %v30_v5  ;;  %768 = vmatpush3.msra.mxu1 %v277_v8  ;;  %v269_v24 = vld [vmem:[%s1153_s3 + $0x28] sm:$0xff]  ;;  %v40_v26 = vld [vmem:[%s1152_s0 + $0x70] sm:$0xff]  ;;  %v268_v27 = vld [vmem:[%s1153_s3 + $0x20] sm:$0xff] }
   0xa   :  { %769 = vmatprep.subr.mxu1 %v276_v11  ;;  %v39_v25 = vld [vmem:[%s1152_s0 + $0x68] sm:$0xff]  ;;  %v41_v28 = vld [vmem:[%s1152_s0 + $0x78] sm:$0xff]  ;;  %v266_v30 = vld [vmem:[%s1153_s3 + $0x10] sm:$0xff] }
   0xb   :  { %770 = vmatpush3.msra.mxu1 %v276_v11  ;;  %v267_v29 = vld [vmem:[%s1153_s3 + $0x18] sm:$0xff]  ;;  %v265_v31 = vld [vmem:[%s1153_s3 + $0x8] sm:$0xff]  ;;  %v264_v32 = vld [vmem:[%s1153_s3] sm:$0xff] }
   0xc   :  { %746 = vmatmul.mubr.msk.f32.gmra.mxu0 %vm50_vm1, %v31_v9  ;;  %771 = vmatprep.subr.mxu1 %v275_v12  ;;  %v463_v33 = vld [vmem:[%s1154_s5 + $0x78] sm:$0xff]  ;;  %v462_v34 = vld [vmem:[%s1154_s5 + $0x70] sm:$0xff]  ;;  %v461_v35 = vld [vmem:[%s1154_s5 + $0x68] sm:$0xff] }
   0xd   :  { %748 = vmatprep.mubr.msk.f32.mxu0 %vm50_vm1, %v32_v10  ;;  %772 = vmatpush3.msra.mxu1 %v275_v12  ;;  %v460_v36 = vld [vmem:[%s1154_s5 + $0x60] sm:$0xff]  ;;  %v459_v37 = vld [vmem:[%s1154_s5 + $0x58] sm:$0xff]  ;;  %v458_v38 = vld [vmem:[%s1154_s5 + $0x50] sm:$0xff] }
   0xe   :  { %773 = vmatprep.subr.mxu1 %v274_v15  ;;  %819 = vmatprep.subr.mxu0 %v463_v33  ;;  %v457_v39 = vld [vmem:[%s1154_s5 + $0x48] sm:$0xff]  ;;  %v456_v40 = vld [vmem:[%s1154_s5 + $0x40] sm:$0xff]  ;;  %v455_v41 = vld [vmem:[%s1154_s5 + $0x38] sm:$0xff] }
   0xf   :  { %774 = vmatpush3.msra.mxu1 %v274_v15  ;;  %820 = vmatpush3.msra.mxu0 %v463_v33  ;;  %v454_v42 = vld [vmem:[%s1154_s5 + $0x30] sm:$0xff]  ;;  %v453_v43 = vld [vmem:[%s1154_s5 + $0x28] sm:$0xff]  ;;  %v452_v44 = vld [vmem:[%s1154_s5 + $0x20] sm:$0xff] }
  0x10   :  { %749 = vmatmul.mubr.msk.f32.gmra.mxu0 %vm50_vm1, %v33_v13  ;;  %775 = vmatprep.subr.mxu1 %v273_v16  ;;  %v451_v45 = vld [vmem:[%s1154_s5 + $0x18] sm:$0xff]  ;;  %v636_v46 = vld [vmem:[%s1155_s2] ss:$0 sm:$0xff] }
  0x11   :  { %751 = vmatprep.mubr.msk.f32.mxu0 %vm50_vm1, %v34_v14  ;;  %776 = vmatpush3.msra.mxu1 %v273_v16  ;;  %v448_v33 = vld [vmem:[%s1154_s5] sm:$0xff] }
  0x12   :  { %777 = vmatprep.subr.mxu1 %v272_v19  ;;  %821 = vmatprep.subr.mxu0 %v462_v34 }
  0x13   :  { %778 = vmatpush3.msra.mxu1 %v272_v19  ;;  %822 = vmatpush3.msra.mxu0 %v462_v34  ;;  %v654_v34 = vld [vmem:[%s1156_s4] ss:$0 sm:$0xff] }
  0x14   :  { %752 = vmatmul.mubr.msk.f32.gmra.mxu0 %vm50_vm1, %v35_v17  ;;  %779 = vmatprep.subr.mxu1 %v271_v20 }
  0x15   :  { %754 = vmatprep.mubr.msk.f32.mxu0 %vm50_vm1, %v36_v18  ;;  %780 = vmatpush3.msra.mxu1 %v271_v20 }
  0x16   :  { %781 = vmatprep.subr.mxu1 %v270_v23  ;;  %823 = vmatprep.subr.mxu0 %v461_v35 }
  0x17   :  { %782 = vmatpush3.msra.mxu1 %v270_v23  ;;  %824 = vmatpush3.msra.mxu0 %v461_v35 }
  0x18   :  { %755 = vmatmul.mubr.msk.f32.gmra.mxu0 %vm50_vm1, %v37_v21  ;;  %783 = vmatprep.subr.mxu1 %v269_v24 }
  0x19   :  { %757 = vmatprep.mubr.msk.f32.mxu0 %vm50_vm1, %v38_v22  ;;  %784 = vmatpush3.msra.mxu1 %v269_v24 }
  0x1a   :  { %785 = vmatprep.subr.mxu1 %v268_v27  ;;  %825 = vmatprep.subr.mxu0 %v460_v36 }
  0x1b   :  { %786 = vmatpush3.msra.mxu1 %v268_v27  ;;  %826 = vmatpush3.msra.mxu0 %v460_v36 }
  0x1c   :  { %758 = vmatmul.mubr.msk.f32.gmra.mxu0 %vm50_vm1, %v39_v25  ;;  %787 = vmatprep.subr.mxu1 %v267_v29 }
  0x1d   :  { %760 = vmatprep.mubr.msk.f32.mxu0 %vm50_vm1, %v40_v26  ;;  %788 = vmatpush3.msra.mxu1 %v267_v29 }
  0x1e   :  { %789 = vmatprep.subr.mxu1 %v266_v30  ;;  %827 = vmatprep.subr.mxu0 %v459_v37 }
  0x1f   :  { %790 = vmatpush3.msra.mxu1 %v266_v30  ;;  %828 = vmatpush3.msra.mxu0 %v459_v37 }
  0x20   :  { %761 = vmatmul.mubr.msk.f32.gmra.mxu0 %vm50_vm1, %v41_v28  ;;  %791 = vmatprep.subr.mxu1 %v265_v31 }
  0x21   :  { %792 = vmatpush3.msra.mxu1 %v265_v31  ;;  %829 = vmatprep.subr.mxu0 %v458_v38  ;;  %v450_v31 = vld [vmem:[%s1154_s5 + $0x10] sm:$0xff] }
  0x22   :  { %793 = vmatprep.subr.mxu1 %v264_v32  ;;  %830 = vmatpush3.msra.mxu0 %v458_v38 }
  0x23   :  { %794 = vmatpush3.msra.mxu1 %v264_v32  ;;  %831 = vmatprep.subr.mxu0 %v457_v39  ;;  %v449_v32 = vld [vmem:[%s1154_s5 + $0x8] sm:$0xff] }
  0x24   :  { %832 = vmatpush3.msra.mxu0 %v457_v39 }
  0x25   :  { %833 = vmatprep.subr.mxu0 %v456_v40 }
  0x26   :  { %834 = vmatpush3.msra.mxu0 %v456_v40 }
  0x27   :  { %835 = vmatprep.subr.mxu0 %v455_v41 }
  0x28   :  { %836 = vmatpush3.msra.mxu0 %v455_v41 }
  0x29   :  { %837 = vmatprep.subr.mxu0 %v454_v42 }
  0x2a   :  { %838 = vmatpush3.msra.mxu0 %v454_v42 }
  0x2b   :  { %839 = vmatprep.subr.mxu0 %v453_v43 }
  0x2c   :  { %840 = vmatpush3.msra.mxu0 %v453_v43 }
  0x2d   :  { %841 = vmatprep.subr.mxu0 %v452_v44 }
  0x2e   :  { %842 = vmatpush3.msra.mxu0 %v452_v44 }
  0x2f   :  { %843 = vmatprep.subr.mxu0 %v451_v45 }
  0x30   :  { %844 = vmatpush3.msra.mxu0 %v451_v45 }
  0x31   :  { %845 = vmatprep.subr.mxu0 %v450_v31 }
  0x32   :  { %846 = vmatpush3.msra.mxu0 %v450_v31 }
  0x33   :  { %847 = vmatprep.subr.mxu0 %v449_v32 }
  0x34   :  { %848 = vmatpush3.msra.mxu0 %v449_v32 }
  0x35   :  { %849 = vmatprep.subr.mxu0 %v448_v33 }
  0x36   :  { %850 = vmatpush3.msra.mxu0 %v448_v33 }
  0xc4   :  { %v741_v47 = vpop.f32.mrf.mxu0 }
  0xc5   :  { %v175_v48 = vadd.f32 %v741_v47, %v636_v46 }
  0xc6   :  { %v169_v49 = vpop.f32.mrf.mxu0 }
  0xc7   :  { %v170_v50 = vadd.f32 %v636_v46, %v169_v49  ;;  %v249_v53 = vmax.f32 %v175_v48, 0.0 }
  0xc8   :  { %v744_v51 = vpop.f32.mrf.mxu0 }
  0xc9   :  { %v248_v52 = vmax.f32 %v170_v50, 0.0  ;;  %v185_v54 = vadd.f32 %v744_v51, %v636_v46 }
  0xca   :  { %v179_v55 = vpop.f32.mrf.mxu0 }
  0xcb   :  { %v180_v56 = vadd.f32 %v636_v46, %v179_v55  ;;  %795 = vmatprep.mubr.f32.mxu1 %v248_v52  ;;  %v251_v59 = vmax.f32 %v185_v54, 0.0 }
  0xcc   :  { %v747_v57 = vpop.f32.mrf.mxu0  ;;  %796 = vmatmul.mubr.f32.vlgmr.msra.gmra.mxu1 %v249_v53 }
  0xcd   :  { %v250_v58 = vmax.f32 %v180_v56, 0.0  ;;  %v195_v60 = vadd.f32 %v747_v57, %v636_v46 }
  0xce   :  { %v189_v61 = vpop.f32.mrf.mxu0 }
  0xcf   :  { %v190_v62 = vadd.f32 %v636_v46, %v189_v61  ;;  %798 = vmatprep.mubr.f32.mxu1 %v250_v58  ;;  %v253_v1 = vmax.f32 %v195_v60, 0.0 }
  0xd0   :  { %v750_v63 = vpop.f32.mrf.mxu0  ;;  %799 = vmatmul.mubr.f32.gmra.mxu1 %v251_v59 }
  0xd1   :  { %v252_v0 = vmax.f32 %v190_v62, 0.0  ;;  %v205_v2 = vadd.f32 %v750_v63, %v636_v46 }
  0xd2   :  { %v199_v3 = vpop.f32.mrf.mxu0 }
  0xd3   :  { %v200_v4 = vadd.f32 %v636_v46, %v199_v3  ;;  %801 = vmatprep.mubr.f32.mxu1 %v252_v0  ;;  %v255_v7 = vmax.f32 %v205_v2, 0.0 }
  0xd4   :  { %v753_v5 = vpop.f32.mrf.mxu0  ;;  %802 = vmatmul.mubr.f32.gmra.mxu1 %v253_v1 }
  0xd5   :  { %v254_v6 = vmax.f32 %v200_v4, 0.0  ;;  %v215_v8 = vadd.f32 %v753_v5, %v636_v46 }
  0xd6   :  { %v209_v9 = vpop.f32.mrf.mxu0 }
  0xd7   :  { %v210_v10 = vadd.f32 %v636_v46, %v209_v9  ;;  %804 = vmatprep.mubr.f32.mxu1 %v254_v6  ;;  %v257_v13 = vmax.f32 %v215_v8, 0.0 }
  0xd8   :  { %v756_v11 = vpop.f32.mrf.mxu0  ;;  %805 = vmatmul.mubr.f32.gmra.mxu1 %v255_v7 }
  0xd9   :  { %v256_v12 = vmax.f32 %v210_v10, 0.0  ;;  %v225_v14 = vadd.f32 %v756_v11, %v636_v46 }
  0xda   :  { %v219_v15 = vpop.f32.mrf.mxu0 }
  0xdb   :  { %v220_v16 = vadd.f32 %v636_v46, %v219_v15  ;;  %807 = vmatprep.mubr.f32.mxu1 %v256_v12  ;;  %v259_v19 = vmax.f32 %v225_v14, 0.0 }
  0xdc   :  { %v759_v17 = vpop.f32.mrf.mxu0  ;;  %808 = vmatmul.mubr.f32.gmra.mxu1 %v257_v13 }
  0xdd   :  { %v258_v18 = vmax.f32 %v220_v16, 0.0  ;;  %v235_v20 = vadd.f32 %v759_v17, %v636_v46 }
  0xde   :  { %v229_v21 = vpop.f32.mrf.mxu0 }
  0xdf   :  { %v230_v22 = vadd.f32 %v636_v46, %v229_v21  ;;  %810 = vmatprep.mubr.f32.mxu1 %v258_v18  ;;  %v261_v25 = vmax.f32 %v235_v20, 0.0 }
  0xe0   :  { %v762_v23 = vpop.f32.mrf.mxu0  ;;  %811 = vmatmul.mubr.f32.gmra.mxu1 %v259_v19  ;;  %v655_v19 = vld [vmem:[%s1157_s6] ss:$0 sm:$0xff] }
  0xe1   :  { %v260_v24 = vmax.f32 %v230_v22, 0.0  ;;  %v245_v26 = vadd.f32 %v762_v23, %v636_v46 }
  0xe2   :  { %v239_v27 = vpop.f32.mrf.mxu0 }
  0xe3   :  { %v240_v28 = vadd.f32 %v636_v46, %v239_v27  ;;  %813 = vmatprep.mubr.f32.mxu1 %v260_v24  ;;  %v263_v30 = vmax.f32 %v245_v26, 0.0 }
  0xe4   :  { %814 = vmatmul.mubr.f32.gmra.mxu1 %v261_v25 }
  0xe5   :  { %v262_v29 = vmax.f32 %v240_v28, 0.0 }
  0xe7   :  { %816 = vmatprep.mubr.f32.mxu1 %v262_v29 }
  0xe8   :  { %817 = vmatmul.mubr.f32.gmra.mxu1 %v263_v30 }
 0x18c   :  { %v797_v35 = vpop.f32.mrf.mxu1 }
 0x18d   :  { %v359_v36 = vadd.f32 %v797_v35, %v654_v34 }
 0x18e   :  { %v353_v37 = vpop.f32.mrf.mxu1 }
 0x18f   :  { %v354_v38 = vadd.f32 %v654_v34, %v353_v37  ;;  %v433_v41 = vmax.f32 %v359_v36, 0.0 }
 0x190   :  { %v800_v39 = vpop.f32.mrf.mxu1 }
 0x191   :  { %v432_v40 = vmax.f32 %v354_v38, 0.0  ;;  %v369_v42 = vadd.f32 %v800_v39, %v654_v34 }
 0x192   :  { %v363_v43 = vpop.f32.mrf.mxu1 }
 0x193   :  { %v364_v44 = vadd.f32 %v654_v34, %v363_v43  ;;  %851 = vmatprep.mubr.f32.mxu0 %v432_v40  ;;  %v435_v47 = vmax.f32 %v369_v42, 0.0 }
 0x194   :  { %v803_v45 = vpop.f32.mrf.mxu1  ;;  %852 = vmatmul.mubr.f32.vlgmr.msra.gmra.mxu0 %v433_v41 }
 0x195   :  { %v434_v46 = vmax.f32 %v364_v44, 0.0  ;;  %v379_v48 = vadd.f32 %v803_v45, %v654_v34 }
 0x196   :  { %v373_v49 = vpop.f32.mrf.mxu1 }
 0x197   :  { %v374_v50 = vadd.f32 %v654_v34, %v373_v49  ;;  %854 = vmatprep.mubr.f32.mxu0 %v434_v46  ;;  %v437_v53 = vmax.f32 %v379_v48, 0.0 }
 0x198   :  { %v806_v51 = vpop.f32.mrf.mxu1  ;;  %855 = vmatmul.mubr.f32.gmra.mxu0 %v435_v47 }
 0x199   :  { %v436_v52 = vmax.f32 %v374_v50, 0.0  ;;  %v389_v54 = vadd.f32 %v806_v51, %v654_v34 }
 0x19a   :  { %v383_v55 = vpop.f32.mrf.mxu1 }
 0x19b   :  { %v384_v56 = vadd.f32 %v654_v34, %v383_v55  ;;  %857 = vmatprep.mubr.f32.mxu0 %v436_v52  ;;  %v439_v59 = vmax.f32 %v389_v54, 0.0 }
 0x19c   :  { %v809_v57 = vpop.f32.mrf.mxu1  ;;  %858 = vmatmul.mubr.f32.gmra.mxu0 %v437_v53 }
 0x19d   :  { %v438_v58 = vmax.f32 %v384_v56, 0.0  ;;  %v399_v60 = vadd.f32 %v809_v57, %v654_v34 }
 0x19e   :  { %v393_v61 = vpop.f32.mrf.mxu1 }
 0x19f   :  { %v394_v62 = vadd.f32 %v654_v34, %v393_v61  ;;  %860 = vmatprep.mubr.f32.mxu0 %v438_v58  ;;  %v441_v1 = vmax.f32 %v399_v60, 0.0 }
 0x1a0   :  { %v812_v63 = vpop.f32.mrf.mxu1  ;;  %861 = vmatmul.mubr.f32.gmra.mxu0 %v439_v59 }
 0x1a1   :  { %v440_v0 = vmax.f32 %v394_v62, 0.0  ;;  %v409_v2 = vadd.f32 %v812_v63, %v654_v34 }
 0x1a2   :  { %v403_v3 = vpop.f32.mrf.mxu1 }
 0x1a3   :  { %v404_v4 = vadd.f32 %v654_v34, %v403_v3  ;;  %863 = vmatprep.mubr.f32.mxu0 %v440_v0  ;;  %v443_v7 = vmax.f32 %v409_v2, 0.0 }
 0x1a4   :  { %v815_v5 = vpop.f32.mrf.mxu1  ;;  %864 = vmatmul.mubr.f32.gmra.mxu0 %v441_v1 }
 0x1a5   :  { %v442_v6 = vmax.f32 %v404_v4, 0.0  ;;  %v419_v8 = vadd.f32 %v815_v5, %v654_v34 }
 0x1a6   :  { %v413_v9 = vpop.f32.mrf.mxu1 }
 0x1a7   :  { %v414_v10 = vadd.f32 %v654_v34, %v413_v9  ;;  %866 = vmatprep.mubr.f32.mxu0 %v442_v6  ;;  %v445_v13 = vmax.f32 %v419_v8, 0.0 }
 0x1a8   :  { %v818_v11 = vpop.f32.mrf.mxu1  ;;  %867 = vmatmul.mubr.f32.gmra.mxu0 %v443_v7 }
 0x1a9   :  { %v444_v12 = vmax.f32 %v414_v10, 0.0  ;;  %v429_v14 = vadd.f32 %v818_v11, %v654_v34 }
 0x1aa   :  { %v423_v15 = vpop.f32.mrf.mxu1 }
 0x1ab   :  { %v424_v16 = vadd.f32 %v654_v34, %v423_v15  ;;  %869 = vmatprep.mubr.f32.mxu0 %v444_v12  ;;  %v447_v18 = vmax.f32 %v429_v14, 0.0 }
 0x1ac   :  { %870 = vmatmul.mubr.f32.gmra.mxu0 %v445_v13 }
 0x1ad   :  { %v446_v17 = vmax.f32 %v424_v16, 0.0 }
 0x1af   :  { %872 = vmatprep.mubr.f32.mxu0 %v446_v17 }
 0x1b0   :  { %873 = vmatmul.mubr.f32.gmra.mxu0 %v447_v18 }
 0x254   :  { %v853_v20 = vpop.f32.mrf.mxu0 }
 0x255   :  { %v543_v21 = vadd.f32 %v853_v20, %v655_v19 }
 0x256   :  { %v537_v22 = vpop.f32.mrf.mxu0 }
 0x257   :  { %617 = vst.msk [vmem:[%s1158_s7 + $0x8] sm:$0xff] %vm50_vm1, %v543_v21  ;;  %v538_v23 = vadd.f32 %v655_v19, %v537_v22 }
 0x258   :  { %v856_v24 = vpop.f32.mrf.mxu0 }
 0x259   :  { %616 = vst.msk [vmem:[%s1158_s7] sm:$0xff] %vm50_vm1, %v538_v23  ;;  %v553_v25 = vadd.f32 %v856_v24, %v655_v19 }
 0x25a   :  { %v547_v26 = vpop.f32.mrf.mxu0 }
 0x25b   :  { %619 = vst.msk [vmem:[%s1158_s7 + $0x18] sm:$0xff] %vm50_vm1, %v553_v25  ;;  %v548_v27 = vadd.f32 %v655_v19, %v547_v26 }
 0x25c   :  { %v859_v28 = vpop.f32.mrf.mxu0 }
 0x25d   :  { %618 = vst.msk [vmem:[%s1158_s7 + $0x10] sm:$0xff] %vm50_vm1, %v548_v27  ;;  %v563_v29 = vadd.f32 %v859_v28, %v655_v19 }
 0x25e   :  { %v557_v30 = vpop.f32.mrf.mxu0 }
 0x25f   :  { %621 = vst.msk [vmem:[%s1158_s7 + $0x28] sm:$0xff] %vm50_vm1, %v563_v29  ;;  %v558_v31 = vadd.f32 %v655_v19, %v557_v30 }
 0x260   :  { %v862_v32 = vpop.f32.mrf.mxu0 }
 0x261   :  { %620 = vst.msk [vmem:[%s1158_s7 + $0x20] sm:$0xff] %vm50_vm1, %v558_v31  ;;  %v573_v33 = vadd.f32 %v862_v32, %v655_v19 }
 0x262   :  { %v567_v34 = vpop.f32.mrf.mxu0 }
 0x263   :  { %623 = vst.msk [vmem:[%s1158_s7 + $0x38] sm:$0xff] %vm50_vm1, %v573_v33  ;;  %v568_v35 = vadd.f32 %v655_v19, %v567_v34 }
 0x264   :  { %v865_v36 = vpop.f32.mrf.mxu0 }
 0x265   :  { %622 = vst.msk [vmem:[%s1158_s7 + $0x30] sm:$0xff] %vm50_vm1, %v568_v35  ;;  %v583_v37 = vadd.f32 %v865_v36, %v655_v19 }
 0x266   :  { %v577_v38 = vpop.f32.mrf.mxu0 }
 0x267   :  { %625 = vst.msk [vmem:[%s1158_s7 + $0x48] sm:$0xff] %vm50_vm1, %v583_v37  ;;  %v578_v39 = vadd.f32 %v655_v19, %v577_v38 }
 0x268   :  { %v868_v40 = vpop.f32.mrf.mxu0 }
 0x269   :  { %624 = vst.msk [vmem:[%s1158_s7 + $0x40] sm:$0xff] %vm50_vm1, %v578_v39  ;;  %v593_v41 = vadd.f32 %v868_v40, %v655_v19 }
 0x26a   :  { %v587_v42 = vpop.f32.mrf.mxu0 }
 0x26b   :  { %627 = vst.msk [vmem:[%s1158_s7 + $0x58] sm:$0xff] %vm50_vm1, %v593_v41  ;;  %v588_v43 = vadd.f32 %v655_v19, %v587_v42 }
 0x26c   :  { %v871_v44 = vpop.f32.mrf.mxu0 }
 0x26d   :  { %626 = vst.msk [vmem:[%s1158_s7 + $0x50] sm:$0xff] %vm50_vm1, %v588_v43  ;;  %v603_v45 = vadd.f32 %v871_v44, %v655_v19 }
 0x26e   :  { %v597_v46 = vpop.f32.mrf.mxu0 }
 0x26f   :  { %629 = vst.msk [vmem:[%s1158_s7 + $0x68] sm:$0xff] %vm50_vm1, %v603_v45  ;;  %v598_v47 = vadd.f32 %v655_v19, %v597_v46 }
 0x270   :  { %v874_v48 = vpop.f32.mrf.mxu0 }
 0x271   :  { %628 = vst.msk [vmem:[%s1158_s7 + $0x60] sm:$0xff] %vm50_vm1, %v598_v47  ;;  %v613_v49 = vadd.f32 %v874_v48, %v655_v19 }
 0x272   :  { %v607_v50 = vpop.f32.mrf.mxu0 }
 0x273   :  { %631 = vst.msk [vmem:[%s1158_s7 + $0x78] sm:$0xff] %vm50_vm1, %v613_v49  ;;  %v608_v51 = vadd.f32 %v655_v19, %v607_v50 }
 0x275   :  { %630 = vst.msk [vmem:[%s1158_s7 + $0x70] sm:$0xff] %vm50_vm1, %v608_v51 }

</bundles_post_ra>
